<compile_context>
chip_gen: v7x
topology: tpu7x:2x2x1
jax: 0.10.0
libtpu: 0.0.40
codegen_flags: <defaults>
</compile_context>

<pallas_src>
import functools
import math

import jax
import jax.numpy as jnp
from jax.experimental import pallas as pl
from jax.experimental.pallas import tpu as pltpu


def _round_up(x, m):
    return ((x + m - 1) // m) * m


# ----------------------------------------------------------------------------
# Kernels
# ----------------------------------------------------------------------------
def _cast_operands(x, w):
    """Trace-time dtype handling that mirrors `x.float()` in the reference."""
    if not jnp.issubdtype(x.dtype, jnp.floating):
        x = x.astype(jnp.float32)                      # integer inputs -> f32
    if x.dtype != w.dtype:                             # mixed float dtypes -> f32
        x = x.astype(jnp.float32)
        w = w.astype(jnp.float32)
    return x, w


def _linear_kernel(x_ref, w_ref, b_ref, o_ref):
    # One batch tile: (TM, K) @ (K, NC) + (1, NC) -> (TM, NC), f32 accumulation.
    x, w = _cast_operands(x_ref[...], w_ref[...])
    o_ref[...] = jnp.dot(x, w, preferred_element_type=jnp.float32) + b_ref[...]


def _linear_kernel_ktiled(x_ref, w_ref, b_ref, o_ref, acc_ref):
    # K-reduction fallback: accumulate partial products over the K grid axis.
    k = pl.program_id(1)

    @pl.when(k == 0)
    def _():
        acc_ref[...] = jnp.zeros_like(acc_ref)

    x, w = _cast_operands(x_ref[...], w_ref[...])
    acc_ref[...] += jnp.dot(x, w, preferred_element_type=jnp.float32)

    @pl.when(k == pl.num_programs(1) - 1)
    def _():
        o_ref[...] = acc_ref[...] + b_ref[...]


# ----------------------------------------------------------------------------
# Parameter prep (one-time, outside the hot path)
# ----------------------------------------------------------------------------
def prepare_single_layer_params(weight, bias, *, param_dtype=jnp.float32):
    """Convert from the PyTorch nn.Linear layout.

    weight: (num_classes, num_inputs) -> (num_inputs, num_classes)
    bias:   (num_classes,)            -> (1, num_classes) float32
    Use param_dtype=jnp.bfloat16 when activations are bf16 to keep the native
    bf16 MXU path (no in-kernel upcast).
    """
    num_classes, _ = weight.shape
    w_t = jnp.asarray(weight, param_dtype).T                      # (K, NC)
    b2 = jnp.asarray(bias, jnp.float32).reshape(1, num_classes)   # (1, NC)
    return w_t, b2


def init_single_layer_params(key, num_inputs, num_classes):
    """nn.Linear default init (uniform +-1/sqrt(fan_in)), PyTorch layout."""
    k_w, k_b = jax.random.split(key)
    bound = 1.0 / math.sqrt(num_inputs)
    weight = jax.random.uniform(
        k_w, (num_classes, num_inputs), jnp.float32, minval=-bound, maxval=bound)
    bias = jax.random.uniform(
        k_b, (num_classes,), jnp.float32, minval=-bound, maxval=bound)
    return weight, bias


# ----------------------------------------------------------------------------
# Generation-aware sizing
# ----------------------------------------------------------------------------
def _vmem_config():
    """(tile-sizing budget, vmem_limit_bytes) per TPU generation."""
    kind = jax.devices()[0].device_kind.lower()
    if any(g in kind for g in ("v4", "v5", "v6")):
        # 128 MiB physical VMEM per TensorCore: let K stay resident / TM grow.
        return 48 * 1024 * 1024, 64 * 1024 * 1024
    # v7x (64 MiB per TC) or unknown: conservative.
    return 24 * 1024 * 1024, 32 * 1024 * 1024


def _batch_semantics():
    """CORE_PARALLEL on v7x so both TensorCores stream the batch axis."""
    kind = jax.devices()[0].device_kind.lower()
    core_parallel = getattr(pltpu, "CORE_PARALLEL", None)
    if "v7" in kind and core_parallel is not None:
        return core_parallel
    return "parallel"


def _finalize_tm(tm, batch):
    tm = int(min(tm, 8192))
    if tm >= batch:
        return batch                      # one full-extent block (always legal)
    return max(8, (tm // 8) * 8)          # tiles: multiple of 8 sublanes


def _choose_tiles(batch, k, nc, x_item, w_item, budget_bytes, force_k_tile=None):
    """Returns (tm, tk); tk is None for the resident-W (no K tiling) path."""
    if force_k_tile is None:
        resident = 2 * (k * nc * w_item + nc * 4)        # W + bias (double-buffered)
        per_row = 2 * (k * x_item + nc * 4)              # x + out rows (double-buffered)
        if resident + 8 * per_row <= budget_bytes:
            tm = (budget_bytes - resident) // per_row
            return _finalize_tm(tm, batch), None
        # Resident W does not fit -> stream W over a K-reduction grid axis.
        tk = 2048
        while tk > 128 and 2 * tk * nc * w_item > budget_bytes // 2:
            tk //= 2
    else:
        tk = force_k_tile
    tk = int(min(tk, _round_up(k, 128)))
    w_bytes = 2 * tk * nc * w_item + 2 * nc * 4
    per_row = 2 * tk * x_item + 2 * nc * 4 + nc * 4      # x, out (dbl-buf), acc
    avail = budget_bytes - w_bytes
    tm = avail // per_row if avail > 0 else 8
    return _finalize_tm(tm, batch), tk


# ----------------------------------------------------------------------------
# Forward
# ----------------------------------------------------------------------------
def single_layer_forward(x, w_t, b2, *, block_batch=None, force_k_tile=None):
    """
    x:   (batch, num_inputs)       f32 / bf16 (integer inputs are cast, like x.float())
    w_t: (num_inputs, num_classes) from prepare_single_layer_params
    b2:  (1, num_classes)          from prepare_single_layer_params
    returns (batch, num_classes) float32
    """
    batch, num_inputs = x.shape
    kw, num_classes = w_t.shape
    assert kw == num_inputs, "weight/input feature mismatch"

    budget, vmem_limit = _vmem_config()
    if block_batch is not None:
        tm, tk = block_batch, force_k_tile
    else:
        tm, tk = _choose_tiles(batch, num_inputs, num_classes,
                               x.dtype.itemsize, w_t.dtype.itemsize,
                               budget, force_k_tile=force_k_tile)

    batch_sem = _batch_semantics()
    k_sem = "arbitrary" if isinstance(batch_sem, str) else pltpu.ARBITRARY

    cost = pl.CostEstimate(
        flops=2 * batch * num_inputs * num_classes,
        transcendentals=0,
        bytes_accessed=int(x.size * x.dtype.itemsize
                           + w_t.size * w_t.dtype.itemsize
                           + b2.size * 4
                           + batch * num_classes * 4),
    )

    out_shape = jax.ShapeDtypeStruct((batch, num_classes), jnp.float32)

    if tk is None:
        # Resident-W path: W/bias stay in VMEM, x/out streamed over batch tiles.
        return pl.pallas_call(
            _linear_kernel,
            out_shape=out_shape,
            grid_spec=pltpu.PrefetchScalarGridSpec(
                num_scalar_prefetch=0,
                grid=(pl.cdiv(batch, tm),),
                in_specs=[
                    pl.BlockSpec((tm, num_inputs), lambda i: (i, 0)),
                    pl.BlockSpec((num_inputs, num_classes), lambda i: (0, 0)),
                    pl.BlockSpec((1, num_classes), lambda i: (0, 0)),
                ],
                out_specs=pl.BlockSpec((tm, num_classes), lambda i: (i, 0)),
            ),
            compiler_params=pltpu.CompilerParams(
                dimension_semantics=(batch_sem,),
                vmem_limit_bytes=vmem_limit,
            ),
            cost_estimate=cost,
        )(x, w_t, b2)

    # K-reduction path: stream W over K tiles, accumulate in f32 scratch.
    return pl.pallas_call(
        _linear_kernel_ktiled,
        out_shape=out_shape,
        grid_spec=pltpu.PrefetchScalarGridSpec(
            num_scalar_prefetch=0,
            grid=(pl.cdiv(batch, tm), pl.cdiv(num_inputs, tk)),
            in_specs=[
                pl.BlockSpec((tm, tk), lambda i, k: (i, k)),
                pl.BlockSpec((tk, num_classes), lambda i, k: (k, 0)),
                pl.BlockSpec((1, num_classes), lambda i, k: (0, 0)),
            ],
            out_specs=pl.BlockSpec((tm, num_classes), lambda i, k: (i, 0)),
            scratch_shapes=[pltpu.VMEM((tm, num_classes), jnp.float32)],
        ),
        compiler_params=pltpu.CompilerParams(
            dimension_semantics=(batch_sem, k_sem),
            vmem_limit_bytes=vmem_limit,
        ),
        cost_estimate=cost,
    )(x, w_t, b2)


# ----------------------------------------------------------------------------
# Self-test
# ----------------------------------------------------------------------------
if __name__ == "__main__":
    key = jax.random.PRNGKey(0)
    k_x, k_p, k_x2, k_p2 = jax.random.split(key, 4)

    # Case 1: small layer, resident-weight path (typical SingleLayer usage).
    batch, num_inputs, num_classes = 16, 32, 10
    x = jax.random.normal(k_x, (batch, num_inputs), dtype=jnp.float32)
    weight, bias = init_single_layer_params(k_p, num_inputs, num_classes)
    w_t, b2 = prepare_single_layer_params(weight, bias)      # one-time prep

    fwd = jax.jit(single_layer_forward)
    out = jax.block_until_ready(fwd(x, w_t, b2))
    ref = x.astype(jnp.float32) @ weight.T + bias
    assert out.shape == (batch, num_classes)
    assert jnp.allclose(out, ref, atol=1e-5, rtol=1e-5)

    # Case 2: larger num_inputs, exercising the K-reduction fallback path.
    batch2, num_inputs2, num_classes2 = 16, 256, 16
    x2 = jax.random.normal(k_x2, (batch2, num_inputs2), dtype=jnp.float32)
    weight2, bias2 = init_single_layer_params(k_p2, num_inputs2, num_classes2)
    w_t2, b22 = prepare_single_layer_params(weight2, bias2)

    fwd_ktiled = jax.jit(functools.partial(single_layer_forward, force_k_tile=128))
    out2 = jax.block_until_ready(fwd_ktiled(x2, w_t2, b22))
    ref2 = x2.astype(jnp.float32) @ weight2.T + bias2
    assert out2.shape == (batch2, num_classes2)
    assert jnp.allclose(out2, ref2, atol=1e-4, rtol=1e-4)

    print("KERNEL_OK")
</pallas_src>

<mosaic_0001>
module attributes {stable_mosaic.version = 11 : i64} {
  func.func @_linear_kernel(%arg0: i32, %arg1: memref<16x32xf32, #tpu.memory_space<vmem>>, %arg2: memref<32x10xf32, #tpu.memory_space<vmem>>, %arg3: memref<1x10xf32, #tpu.memory_space<vmem>>, %arg4: memref<16x10xf32, #tpu.memory_space<vmem>>) attributes {dimension_semantics = [#tpu.dimension_semantics<parallel>], iteration_bounds = array<i64: 1>, scalar_prefetch = 0 : i64, scratch_operands = 0 : i64, tpu.core_type = #tpu.core_type<tc>, window_params = [{transform_indices = @transform_0, window_bounds = array<i64: 16, 32>}, {pipeline_mode = #tpu.pipeline_mode<synchronous>, transform_indices = @transform_1, window_bounds = array<i64: 32, 10>}, {pipeline_mode = #tpu.pipeline_mode<synchronous>, transform_indices = @transform_2, window_bounds = array<i64: 1, 10>}, {transform_indices = @transform_3, window_bounds = array<i64: 16, 10>}]} {
    %c0 = arith.constant 0 : index
    %c0_0 = arith.constant 0 : index
    %0 = vector.load %arg1[%c0, %c0_0] : memref<16x32xf32, #tpu.memory_space<vmem>>, vector<16x32xf32>
    %c0_1 = arith.constant 0 : index
    %c0_2 = arith.constant 0 : index
    %1 = vector.load %arg2[%c0_1, %c0_2] : memref<32x10xf32, #tpu.memory_space<vmem>>, vector<32x10xf32>
    %cst = arith.constant dense<0.000000e+00> : vector<16x10xf32>
    %2 = tpu.matmul %0, %1, %cst {dimension_numbers = #tpu.dot_dimension_numbers<[1], [0], [0], [1], [0, 0, 1, 1], [], []>} : vector<16x32xf32>, vector<32x10xf32>, vector<16x10xf32> -> vector<16x10xf32>
    %c0_3 = arith.constant 0 : index
    %c0_4 = arith.constant 0 : index
    %3 = vector.load %arg3[%c0_3, %c0_4] : memref<1x10xf32, #tpu.memory_space<vmem>>, vector<1x10xf32>
    %4 = vector.broadcast %3 : vector<1x10xf32> to vector<16x10xf32>
    %5 = arith.addf %2, %4 : vector<16x10xf32>
    %c0_5 = arith.constant 0 : index
    %c0_6 = arith.constant 0 : index
    %6 = vector.load %arg4[%c0_5, %c0_6] : memref<16x10xf32, #tpu.memory_space<vmem>>, vector<16x10xf32>
    tpu.vector_store %arg4[%c0_5, %c0_6], %5 {strides = array<i32>} : memref<16x10xf32, #tpu.memory_space<vmem>>, vector<16x10xf32>,
    return
  }
  func.func @transform_0(%arg0: i32) -> (i32, i32) {
    %c0_i32 = arith.constant 0 : i32
    %c0_i32_0 = arith.constant 0 : i32
    return %arg0, %c0_i32 : i32, i32
  }
  func.func @transform_1(%arg0: i32) -> (i32, i32) {
    %c0_i32 = arith.constant 0 : i32
    %c0_i32_0 = arith.constant 0 : i32
    %c0_i32_1 = arith.constant 0 : i32
    return %c0_i32, %c0_i32_0 : i32, i32
  }
  func.func @transform_2(%arg0: i32) -> (i32, i32) {
    %c0_i32 = arith.constant 0 : i32
    %c0_i32_0 = arith.constant 0 : i32
    %c0_i32_1 = arith.constant 0 : i32
    return %c0_i32, %c0_i32_0 : i32, i32
  }
  func.func @transform_3(%arg0: i32) -> (i32, i32) {
    %c0_i32 = arith.constant 0 : i32
    %c0_i32_0 = arith.constant 0 : i32
    return %arg0, %c0_i32 : i32, i32
  }
}

</mosaic_0001>

<bundles_post_ra>
// kernel: single_layer_forward.1
= control target key start
LH: loop header
LB: loop body
LE: loop exit
PB: predicated region body
PF: predicated region fallthrough
CT: control target
= control target key end

     0   :  { %vm28_vm0 = vcmask 261120   ;;  %s240_s0 = inlined_call_operand.vmem [shape: f32[16,32], index: 0, kind: input, shape index: {}]   ;;  %s241_s1 = inlined_call_operand.vmem [shape: f32[32,10], index: 1, kind: input, shape index: {}]   ;;  %s242_s2 = inlined_call_operand.vmem [shape: f32[1,10], index: 2, kind: input, shape index: {}]   ;;  %s243_s3 = inlined_call_operand.hbm [shape: f32[16,10], index: 3, kind: output, shape index: {}]  }
   0x1   :  { %v17_v0 = vld [vmem:[%s241_s1] sm:$0xff]  ;;  %v18_v1 = vld [vmem:[%s241_s1 + $0x8] sm:$0xff]  ;;  %v19_v2 = vld [vmem:[%s241_s1 + $0x10] sm:$0xff] }
   0x2   :  { %v149_v3 = vpack.c.bf16 %v18_v1, %v17_v0  ;;  %v20_v4 = vld [vmem:[%s241_s1 + $0x18] sm:$0xff]  ;;  %v15_v5 = vld [vmem:[%s240_s0] sm:$0xff] }
   0x3   :  { %v153_v6 = vpack.c.bf16 %v20_v4, %v19_v2  ;;  %146 = vmatprep.mubr.msk.f32.mxu0 %vm28_vm0, %v15_v5 }
   0x4   :  { %8 = vsyncpa [#allocation3], 0  ;;  %150 = vmatprep.subr.bf16.mxu0 %v149_v3  ;;  %v16_v7 = vld [vmem:[%s240_s0 + $0x8] sm:$0xff]  ;;  %v129_v8 = vld [vmem:[%s242_s2] ss:$0 sm:$0xff]  ;;  %s184_s1 = smov [#allocation2]  }
   0x5   :  { %152 = vmatpush3.bf16.msra.mxu0 %v149_v3  ;;  %s118_s26 = sshll.u32 %s184_s1, 4  ;;  %vm110_vm1 = vcmask 80896   ;;  %s119_s26 = int_to_ptr.vmem [resolvable:$true] %s118_s26 }
   0x6   :  { %154 = vmatprep.subr.bf16.mxu0 %v153_v6  ;;  %s160_s27 = scalar_lea.vmem %s119_s26, 256  ;;  %p165_p1 = scmp.lt.s32.totalorder %s119_s26, %s119_s26 }
   0x7   :  { %p161_p0 = scmp.ne.s32.totalorder %s119_s26, %s160_s27  ;;  %p166_p2 = scmp.lt.s32.totalorder %s160_s27, %s160_s27 }
   0x9   :  { %156 = vmatpush3.bf16.msra.mxu0 %v153_v6  ;;  %p167_p3 = por %p166_p2, %p165_p1 }
   0xb   :  { %p168_p4 = pnand %p167_p3, %p161_p0 }
   0xc   :  { %147 = vmatmul.mubr.msk.f32.vlgmr.msra.gmra.mrb[0].mxu0 %vm28_vm0, %v16_v7 }
  0xdf   :  { %v148_v9 = vpop.f32.mrb[0].mxu0 }
  0xe0   :  { %v107_v10 = vadd.f32 %v148_v9, %v129_v8  ;;  %v101_v11 = vpop.f32.mrb[1].mxu0 }
  0xe1   :  { %v102_v12 = vadd.f32 %v129_v8, %v101_v11 }
  0xe2   :  { %112 = vst.msk [vmem:[#allocation2 + $0x8] sm:$0xff] %vm110_vm1, %v107_v10 }
  0xe3   :  { %111 = vst.msk [vmem:[#allocation2] sm:$0xff] %vm110_vm1, %v102_v12 }
  0xe4   :  { %171 = shalt.err (!%p168_p4)
}
  0xe5   :  { %s172_s2 = scalar_lea.hbm %s243_s3, 256 }
  0xe6   :  { %p173_p5 = scmp.ne.s32.totalorder %s243_s3, %s172_s2  ;;  %p176_p6 = scmp.lt.u32.totalorder %s172_s2, %s243_s3 }
  0xe8   :  { %p178_p7 = pnand %p176_p6, %p173_p5 }
  0xea   :  { %181 = shalt.err (!%p178_p7)
}
  0xeb   :  { %s185_s6 = smov 128   ;;  %s186_s7 = smov 8  }
  0xec   :  { %124 = dma.vmem_to_hbm [thread:$0]  %s119_s26, 256, %s243_s3, [#allocation3], %s185_s6, %s185_s6, %s186_s7  }
  0xed   :  { %182 = dma.done.wait [#allocation3], 256  }
  0xee   :  { %183 = vsyncadd [#allocation3], 4294967040 }
  0xef   :  { %128 = vsyncpa [#allocation3], 1 }

</bundles_post_ra>
